<compile_context>
chip_gen: v6e
topology: v6e:2x2x1
jax: 0.10.0
libtpu: 0.0.40
codegen_flags: <defaults>
</compile_context>

<pallas_src>
import jax
import jax.numpy as jnp
from jax.experimental import pallas as pl
from jax.experimental.pallas import tpu as pltpu

EMBEDDING_DIM = 32
HEAD_SIZE = 16


def head_kernel(x_ref, w_ref, o_ref):
    # x_ref: (NG, GB, T, C)   NG lane-groups of GB batch elements (compute dtype)
    # w_ref: (C, 3H)          fused [Wk^T | Wq^T * C^-0.5 | Wv^T], VMEM-resident
    # o_ref: (NG, T, GB*H)    lane-dense output block (GB*H == 128 for H == 16)
    ng, gb, t, c = x_ref.shape
    h = w_ref.shape[1] // 3
    mm_dtype = x_ref.dtype                      # MXU operand dtype (bf16 / f32)

    x2d = x_ref[...].reshape(ng * gb * t, c)    # leading-dim flatten: free
    w = w_ref[...]

    # Fused QKV projection: one MXU matmul, f32 accumulation.
    kqv = jnp.dot(x2d, w, preferred_element_type=jnp.float32)   # (rows, 3H) f32

    k = kqv[:, 0 * h:1 * h].reshape(ng * gb, t, h)
    q = kqv[:, 1 * h:2 * h].reshape(ng * gb, t, h)   # scale already in w_query
    v = kqv[:, 2 * h:3 * h].reshape(ng * gb, t, h)

    # scores[b, s, t] = k[b, s, :] . q[b, t, :]  (== PyTorch weights[b, t, s]).
    # Key index s sits on sublanes, so the softmax reductions below are cheap
    # sublane reductions rather than padded cross-lane XLU reductions.
    # TODO(synk): if the vmatmul slot ever binds (ng*gb tiny MXU pushes), move
    # these batched contractions to the VPU and pack batch onto lanes through
    # the softmax as well; at these shapes the kernel is DMA/overhead-bound.
    scores = jnp.einsum('bsh,bth->bst',
                        k.astype(mm_dtype), q.astype(mm_dtype),
                        preferred_element_type=jnp.float32)      # (B, S, T)

    # Causal mask: key s may attend query t only when s <= t (PyTorch tril).
    s_idx = jax.lax.broadcasted_iota(jnp.int32, (t, t), 0)
    t_idx = jax.lax.broadcasted_iota(jnp.int32, (t, t), 1)
    neg_inf = jnp.float32(float('-inf'))
    masked = jnp.where((s_idx <= t_idx)[None, :, :], scores, neg_inf)

    # Numerically stable softmax over the key axis (axis=-2 == sublanes), f32.
    m = jnp.max(masked, axis=-2, keepdims=True)
    e = jnp.exp(masked - m)
    denom = jnp.sum(e, axis=-2, keepdims=True)
    attn = e / denom                                  # exact divide (EUP)

    # out[b, t, :] = sum_s attn[b, s, t] * v[b, s, :]
    out = jnp.einsum('bst,bsh->bth',
                     attn.astype(mm_dtype), v.astype(mm_dtype),
                     preferred_element_type=jnp.float32)         # (B, T, H)

    # Pack the GB batch elements of each group onto the lane axis so the HBM
    # writeback is a dense (T, GB*H) tile per group (no padded lanes).
    out4 = out.reshape(ng, gb, t, h)
    for j in range(gb):
        o_ref[:, :, j * h:(j + 1) * h] = out4[:, j].astype(o_ref.dtype)


def head_forward(x, w_key, w_query, w_value, *,
                 compute_dtype=jnp.bfloat16, target_rows_per_step=2048):
    """Forward pass of `Head`.

    x: (B, T, C) float32; w_*: (H, C) float32 (PyTorch nn.Linear layout).
    Returns (B, T, H) float32.
    """
    B, T, C = x.shape
    H = w_key.shape[0]
    assert C == EMBEDDING_DIM
    # NOTE: no `T <= head_size` restriction — the in-kernel iota mask is valid
    # for any T (the PyTorch buffer size only constrains the original module).

    # Fuse + pre-transpose the projection weights once, folding the C**-0.5
    # attention scale into the query weights (review #8), then cast to the
    # MXU-native compute dtype (review #4).
    scale = float(C) ** -0.5                     # matches PyTorch c ** (-0.5)
    w_kqv = jnp.concatenate([w_key.T, w_query.T * scale, w_value.T], axis=1)
    w_kqv = w_kqv.astype(compute_dtype)

    # Lane-group size: pack GB batch elements per 128-lane output tile.
    GB = max(1, 128 // H)
    num_groups = pl.cdiv(B, GB)

    # Groups per grid step: target >= target_rows_per_step rows of x per step
    # (review #3), but keep >= 2 grid steps whenever there are >= 2 groups so
    # both v7x TensorCores get work (review #5).
    rows_per_group = GB * T
    groups_per_block = max(1, min(target_rows_per_step // rows_per_group,
                                  num_groups))
    if num_groups >= 2:
        groups_per_block = min(groups_per_block, pl.cdiv(num_groups, 2))

    num_steps = pl.cdiv(num_groups, groups_per_block)
    num_groups_padded = num_steps * groups_per_block
    B_pad = num_groups_padded * GB

    # Zero-pad awkward batch sizes (review #10).  Padded batch elements still
    # see the causal mask (row s=0 is always unmasked) so no NaN can appear;
    # their outputs are sliced away below.
    if B_pad != B:
        x = jnp.pad(x, ((0, B_pad - B), (0, 0), (0, 0)))
    xg = x.astype(compute_dtype).reshape(num_groups_padded, GB, T, C)

    out_packed = pl.pallas_call(
        head_kernel,
        out_shape=jax.ShapeDtypeStruct((num_groups_padded, T, GB * H),
                                       jnp.float32),
        grid_spec=pltpu.PrefetchScalarGridSpec(
            num_scalar_prefetch=0,
            grid=(num_steps,),
            in_specs=[
                # Big block of lane-groups per program.
                pl.BlockSpec((groups_per_block, GB, T, C),
                             lambda i: (i, 0, 0, 0)),
                # Fused weights: constant index_map -> resident in VMEM.
                pl.BlockSpec((C, 3 * H), lambda i: (0, 0)),
            ],
            out_specs=pl.BlockSpec((groups_per_block, T, GB * H),
                                   lambda i: (i, 0, 0)),
        ),
        compiler_params=pltpu.CompilerParams(
            dimension_semantics=("parallel",),
            # Explicit VMEM budget (reviews #3/#6/#7): above v5e's 16 MiB
            # scoped default, well under v7x's 64 MiB physical VMEM.
            vmem_limit_bytes=32 * 1024 * 1024,
        ),
    )(xg, w_kqv)

    # Un-interleave the lane packing: (G, T, GB*H) -> (B, T, H) (cheap XLA op).
    y = out_packed.reshape(num_groups_padded, T, GB, H)
    y = jnp.transpose(y, (0, 2, 1, 3)).reshape(B_pad, T, H)
    return y[:B]


def reference_forward(x, w_key, w_query, w_value):
    """Pure-JAX f32 reference mirroring the PyTorch forward exactly."""
    b, t, c = x.shape
    k = jnp.einsum('btc,hc->bth', x, w_key)
    q = jnp.einsum('btc,hc->bth', x, w_query)
    v = jnp.einsum('btc,hc->bth', x, w_value)
    weights = jnp.einsum('bth,bsh->bts', q, k) * (c ** -0.5)
    tril = jnp.tril(jnp.ones((t, t), jnp.float32))
    masked = jnp.where(tril == 0, float('-inf'), weights)
    attn = jax.nn.softmax(masked, axis=-1)
    return jnp.einsum('bts,bsh->bth', attn, v)


if __name__ == "__main__":
    T, C, H = 8, EMBEDDING_DIM, HEAD_SIZE

    key = jax.random.PRNGKey(0)
    kx1, kx2, kk, kq, kv = jax.random.split(key, 5)

    # Deterministic "nn.Linear"-style weights (uniform, PyTorch default scale).
    bound = 1.0 / (C ** 0.5)
    w_key = jax.random.uniform(kk, (H, C), jnp.float32, -bound, bound)
    w_query = jax.random.uniform(kq, (H, C), jnp.float32, -bound, bound)
    w_value = jax.random.uniform(kv, (H, C), jnp.float32, -bound, bound)

    # Config 1: B=16 -> two full lane groups -> 2 grid steps; bf16 compute path.
    x1 = jax.random.normal(kx1, (16, T, C), dtype=jnp.float32)
    out1 = jax.block_until_ready(head_forward(x1, w_key, w_query, w_value))
    ref1 = reference_forward(x1, w_key, w_query, w_value)
    assert out1.shape == ref1.shape == (16, T, H)
    # Tolerance budget is bf16 input quantization (kernel accumulates in f32
    # and uses an exact softmax divide); observed error is typically ~2e-3.
    assert jnp.allclose(out1, ref1, atol=2e-2, rtol=2e-2), "bf16 path mismatch"

    # Config 2: B=5 (not a multiple of the 8-wide lane group) -> padded-batch
    # path, f32 compute dtype.
    x2 = jax.random.normal(kx2, (5, T, C), dtype=jnp.float32)
    out2 = jax.block_until_ready(
        head_forward(x2, w_key, w_query, w_value, compute_dtype=jnp.float32))
    ref2 = reference_forward(x2, w_key, w_query, w_value)
    assert out2.shape == ref2.shape == (5, T, H)
    assert jnp.allclose(out2, ref2, atol=1e-2, rtol=1e-2), "f32 path mismatch"

    print("KERNEL_OK")
</pallas_src>

<mosaic_0001>
module attributes {stable_mosaic.version = 11 : i64} {
  func.func @head_kernel(%arg0: i32, %arg1: memref<1x8x8x32xbf16, #tpu.memory_space<vmem>>, %arg2: memref<32x48xbf16, #tpu.memory_space<vmem>>, %arg3: memref<1x8x128xf32, #tpu.memory_space<vmem>>) attributes {dimension_semantics = [#tpu.dimension_semantics<parallel>], iteration_bounds = array<i64: 2>, scalar_prefetch = 0 : i64, scratch_operands = 0 : i64, tpu.core_type = #tpu.core_type<tc>, window_params = [{transform_indices = @transform_0, window_bounds = array<i64: 1, 8, 8, 32>}, {pipeline_mode = #tpu.pipeline_mode<synchronous>, transform_indices = @transform_1, window_bounds = array<i64: 32, 48>}, {transform_indices = @transform_2, window_bounds = array<i64: 1, 8, 128>}]} {
    %c0 = arith.constant 0 : index
    %c0_0 = arith.constant 0 : index
    %c0_1 = arith.constant 0 : index
    %c0_2 = arith.constant 0 : index
    %0 = vector.load %arg1[%c0, %c0_0, %c0_1, %c0_2] : memref<1x8x8x32xbf16, #tpu.memory_space<vmem>>, vector<1x8x8x32xbf16>
    %1 = vector.shape_cast %0 : vector<1x8x8x32xbf16> to vector<64x32xbf16>
    %c0_3 = arith.constant 0 : index
    %c0_4 = arith.constant 0 : index
    %2 = vector.load %arg2[%c0_3, %c0_4] : memref<32x48xbf16, #tpu.memory_space<vmem>>, vector<32x48xbf16>
    %cst = arith.constant dense<0.000000e+00> : vector<64x48xf32>
    %3 = tpu.matmul %1, %2, %cst {dimension_numbers = #tpu.dot_dimension_numbers<[1], [0], [0], [1], [0, 0, 1, 1], [], []>} : vector<64x32xbf16>, vector<32x48xbf16>, vector<64x48xf32> -> vector<64x48xf32>
    %4 = vector.extract_strided_slice %3 {offsets = [0, 0], sizes = [64, 16], strides = [1, 1]} : vector<64x48xf32> to vector<64x16xf32>
    %5 = vector.shape_cast %4 : vector<64x16xf32> to vector<8x8x16xf32>
    %6 = vector.extract_strided_slice %3 {offsets = [0, 16], sizes = [64, 16], strides = [1, 1]} : vector<64x48xf32> to vector<64x16xf32>
    %7 = vector.shape_cast %6 : vector<64x16xf32> to vector<8x8x16xf32>
    %8 = vector.extract_strided_slice %3 {offsets = [0, 32], sizes = [64, 16], strides = [1, 1]} : vector<64x48xf32> to vector<64x16xf32>
    %9 = vector.shape_cast %8 : vector<64x16xf32> to vector<8x8x16xf32>
    %10 = arith.truncf %5 : vector<8x8x16xf32> to vector<8x8x16xbf16>
    %11 = arith.truncf %7 : vector<8x8x16xf32> to vector<8x8x16xbf16>
    "tpu.trace_start"() <{level = 10 : i32, message = "bsh,bth->bst"}> : () -> ()
    %cst_5 = arith.constant dense<0.000000e+00> : vector<8x8x8xf32>
    %12 = tpu.matmul %10, %11, %cst_5 {dimension_numbers = #tpu.dot_dimension_numbers<[2], [2], [1], [1], [0, 0, 0, 1, 1, 1], [0], [0]>} : vector<8x8x16xbf16>, vector<8x8x16xbf16>, vector<8x8x8xf32> -> vector<8x8x8xf32>
    "tpu.trace_stop"() : () -> ()
    %13 = tpu.iota {dimensions = array<i32: 0>} : vector<8x8xi32>
    %14 = tpu.iota {dimensions = array<i32: 1>} : vector<8x8xi32>
    %15 = arith.cmpi sle, %13, %14 : vector<8x8xi32>
    %16 = vector.shape_cast %15 : vector<8x8xi1> to vector<1x8x8xi1>
    %cst_6 = arith.constant 0xFF800000 : f32
    %17 = vector.shape_cast %16 : vector<1x8x8xi1> to vector<1x8x8xi1>
    %18 = vector.broadcast %17 : vector<1x8x8xi1> to vector<8x8x8xi1>
    %19 = vector.broadcast %cst_6 : f32 to vector<8x8x8xf32>
    %20 = arith.select %18, %12, %19 : vector<8x8x8xi1>, vector<8x8x8xf32>
    %cst_7 = arith.constant dense<0xFF800000> : vector<8x8xf32>
    %21 = vector.multi_reduction <maximumf>, %20, %cst_7 [1] : vector<8x8x8xf32> to vector<8x8xf32>
    %22 = vector.shape_cast %21 : vector<8x8xf32> to vector<8x1x8xf32>
    %23 = vector.broadcast %22 : vector<8x1x8xf32> to vector<8x8x8xf32>
    %24 = arith.subf %20, %23 : vector<8x8x8xf32>
    %25 = math.exp %24 : vector<8x8x8xf32>
    %cst_8 = arith.constant dense<0.000000e+00> : vector<8x8xf32>
    %26 = vector.multi_reduction <add>, %25, %cst_8 [1] : vector<8x8x8xf32> to vector<8x8xf32>
    %27 = vector.shape_cast %26 : vector<8x8xf32> to vector<8x1x8xf32>
    %28 = vector.broadcast %27 : vector<8x1x8xf32> to vector<8x8x8xf32>
    %29 = arith.divf %25, %28 : vector<8x8x8xf32>
    %30 = arith.truncf %29 : vector<8x8x8xf32> to vector<8x8x8xbf16>
    %31 = arith.truncf %9 : vector<8x8x16xf32> to vector<8x8x16xbf16>
    "tpu.trace_start"() <{level = 10 : i32, message = "bst,bsh->bth"}> : () -> ()
    %cst_9 = arith.constant dense<0.000000e+00> : vector<8x8x16xf32>
    %32 = tpu.matmul %30, %31, %cst_9 {dimension_numbers = #tpu.dot_dimension_numbers<[1], [1], [2], [2], [0, 0, 0, 2, 1, 2], [0], [0]>} : vector<8x8x8xbf16>, vector<8x8x16xbf16>, vector<8x8x16xf32> -> vector<8x8x16xf32>
    "tpu.trace_stop"() : () -> ()
    %33 = vector.shape_cast %32 : vector<8x8x16xf32> to vector<1x8x8x16xf32>
    %34 = vector.extract_strided_slice %33 {offsets = [0, 0, 0, 0], sizes = [1, 1, 8, 16], strides = [1, 1, 1, 1]} : vector<1x8x8x16xf32> to vector<1x1x8x16xf32>
    %35 = vector.shape_cast %34 : vector<1x1x8x16xf32> to vector<1x8x16xf32>
    %c0_10 = arith.constant 0 : index
    %c0_11 = arith.constant 0 : index
    %c0_12 = arith.constant 0 : index
    %36 = vector.load %arg3[%c0_10, %c0_11, %c0_12] : memref<1x8x128xf32, #tpu.memory_space<vmem>>, vector<1x8x16xf32>
    tpu.vector_store %arg3[%c0_10, %c0_11, %c0_12], %35 {strides = array<i32>} : memref<1x8x128xf32, #tpu.memory_space<vmem>>, vector<1x8x16xf32>,
    %37 = vector.extract_strided_slice %33 {offsets = [0, 1, 0, 0], sizes = [1, 1, 8, 16], strides = [1, 1, 1, 1]} : vector<1x8x8x16xf32> to vector<1x1x8x16xf32>
    %38 = vector.shape_cast %37 : vector<1x1x8x16xf32> to vector<1x8x16xf32>
    %c0_13 = arith.constant 0 : index
    %c0_14 = arith.constant 0 : index
    %c16 = arith.constant 16 : index
    %39 = vector.load %arg3[%c0_13, %c0_14, %c16] : memref<1x8x128xf32, #tpu.memory_space<vmem>>, vector<1x8x16xf32>
    tpu.vector_store %arg3[%c0_13, %c0_14, %c16], %38 {strides = array<i32>} : memref<1x8x128xf32, #tpu.memory_space<vmem>>, vector<1x8x16xf32>,
    %40 = vector.extract_strided_slice %33 {offsets = [0, 2, 0, 0], sizes = [1, 1, 8, 16], strides = [1, 1, 1, 1]} : vector<1x8x8x16xf32> to vector<1x1x8x16xf32>
    %41 = vector.shape_cast %40 : vector<1x1x8x16xf32> to vector<1x8x16xf32>
    %c0_15 = arith.constant 0 : index
    %c0_16 = arith.constant 0 : index
    %c32 = arith.constant 32 : index
    %42 = vector.load %arg3[%c0_15, %c0_16, %c32] : memref<1x8x128xf32, #tpu.memory_space<vmem>>, vector<1x8x16xf32>
    tpu.vector_store %arg3[%c0_15, %c0_16, %c32], %41 {strides = array<i32>} : memref<1x8x128xf32, #tpu.memory_space<vmem>>, vector<1x8x16xf32>,
    %43 = vector.extract_strided_slice %33 {offsets = [0, 3, 0, 0], sizes = [1, 1, 8, 16], strides = [1, 1, 1, 1]} : vector<1x8x8x16xf32> to vector<1x1x8x16xf32>
    %44 = vector.shape_cast %43 : vector<1x1x8x16xf32> to vector<1x8x16xf32>
    %c0_17 = arith.constant 0 : index
    %c0_18 = arith.constant 0 : index
    %c48 = arith.constant 48 : index
    %45 = vector.load %arg3[%c0_17, %c0_18, %c48] : memref<1x8x128xf32, #tpu.memory_space<vmem>>, vector<1x8x16xf32>
    tpu.vector_store %arg3[%c0_17, %c0_18, %c48], %44 {strides = array<i32>} : memref<1x8x128xf32, #tpu.memory_space<vmem>>, vector<1x8x16xf32>,
    %46 = vector.extract_strided_slice %33 {offsets = [0, 4, 0, 0], sizes = [1, 1, 8, 16], strides = [1, 1, 1, 1]} : vector<1x8x8x16xf32> to vector<1x1x8x16xf32>
    %47 = vector.shape_cast %46 : vector<1x1x8x16xf32> to vector<1x8x16xf32>
    %c0_19 = arith.constant 0 : index
    %c0_20 = arith.constant 0 : index
    %c64 = arith.constant 64 : index
    %48 = vector.load %arg3[%c0_19, %c0_20, %c64] : memref<1x8x128xf32, #tpu.memory_space<vmem>>, vector<1x8x16xf32>
    tpu.vector_store %arg3[%c0_19, %c0_20, %c64], %47 {strides = array<i32>} : memref<1x8x128xf32, #tpu.memory_space<vmem>>, vector<1x8x16xf32>,
    %49 = vector.extract_strided_slice %33 {offsets = [0, 5, 0, 0], sizes = [1, 1, 8, 16], strides = [1, 1, 1, 1]} : vector<1x8x8x16xf32> to vector<1x1x8x16xf32>
    %50 = vector.shape_cast %49 : vector<1x1x8x16xf32> to vector<1x8x16xf32>
    %c0_21 = arith.constant 0 : index
    %c0_22 = arith.constant 0 : index
    %c80 = arith.constant 80 : index
    %51 = vector.load %arg3[%c0_21, %c0_22, %c80] : memref<1x8x128xf32, #tpu.memory_space<vmem>>, vector<1x8x16xf32>
    tpu.vector_store %arg3[%c0_21, %c0_22, %c80], %50 {strides = array<i32>} : memref<1x8x128xf32, #tpu.memory_space<vmem>>, vector<1x8x16xf32>,
    %52 = vector.extract_strided_slice %33 {offsets = [0, 6, 0, 0], sizes = [1, 1, 8, 16], strides = [1, 1, 1, 1]} : vector<1x8x8x16xf32> to vector<1x1x8x16xf32>
    %53 = vector.shape_cast %52 : vector<1x1x8x16xf32> to vector<1x8x16xf32>
    %c0_23 = arith.constant 0 : index
    %c0_24 = arith.constant 0 : index
    %c96 = arith.constant 96 : index
    %54 = vector.load %arg3[%c0_23, %c0_24, %c96] : memref<1x8x128xf32, #tpu.memory_space<vmem>>, vector<1x8x16xf32>
    tpu.vector_store %arg3[%c0_23, %c0_24, %c96], %53 {strides = array<i32>} : memref<1x8x128xf32, #tpu.memory_space<vmem>>, vector<1x8x16xf32>,
    %55 = vector.extract_strided_slice %33 {offsets = [0, 7, 0, 0], sizes = [1, 1, 8, 16], strides = [1, 1, 1, 1]} : vector<1x8x8x16xf32> to vector<1x1x8x16xf32>
    %56 = vector.shape_cast %55 : vector<1x1x8x16xf32> to vector<1x8x16xf32>
    %c0_25 = arith.constant 0 : index
    %c0_26 = arith.constant 0 : index
    %c112 = arith.constant 112 : index
    %57 = vector.load %arg3[%c0_25, %c0_26, %c112] : memref<1x8x128xf32, #tpu.memory_space<vmem>>, vector<1x8x16xf32>
    tpu.vector_store %arg3[%c0_25, %c0_26, %c112], %56 {strides = array<i32>} : memref<1x8x128xf32, #tpu.memory_space<vmem>>, vector<1x8x16xf32>,
    return
  }
  func.func @transform_0(%arg0: i32) -> (i32, i32, i32, i32) {
    %c0_i32 = arith.constant 0 : i32
    %c0_i32_0 = arith.constant 0 : i32
    %c0_i32_1 = arith.constant 0 : i32
    %c0_i32_2 = arith.constant 0 : i32
    return %arg0, %c0_i32, %c0_i32_0, %c0_i32_1 : i32, i32, i32, i32
  }
  func.func @transform_1(%arg0: i32) -> (i32, i32) {
    %c0_i32 = arith.constant 0 : i32
    %c0_i32_0 = arith.constant 0 : i32
    %c0_i32_1 = arith.constant 0 : i32
    return %c0_i32, %c0_i32_0 : i32, i32
  }
  func.func @transform_2(%arg0: i32) -> (i32, i32, i32) {
    %c0_i32 = arith.constant 0 : i32
    %c0_i32_0 = arith.constant 0 : i32
    %c0_i32_1 = arith.constant 0 : i32
    return %arg0, %c0_i32, %c0_i32_0 : i32, i32, i32
  }
}

</mosaic_0001>

<bundles_post_ra>
// kernel: tpu_custom_call.1
= control target key start
LH: loop header
LB: loop body
LE: loop exit
PB: predicated region body
PF: predicated region fallthrough
CT: control target
= control target key end

     0   :  { %7 = vsyncpa [#allocation3], 0  ;;  %s2323_s0 = inlined_call_operand.hbm [shape: bf16[2,8,8,32], index: 0, kind: input, shape index: {}]   ;;  %s2324_s1 = inlined_call_operand.hbm [shape: bf16[32,48], index: 1, kind: input, shape index: {}]   ;;  %s2325_s2 = inlined_call_operand.hbm [shape: f32[2,8,128], index: 2, kind: output, shape index: {}]  }
   0x1   :  { %9 = vsyncpa [#allocation3 + $0x1], 0 }
   0x2   :  { %10 = vsyncpa [#allocation6], 0 }
   0x3   :  { %11 = vsyncpa [#allocation4], 0 }
   0x4   :  { %13 = vsyncpa [#allocation4 + $0x1], 0  ;;  %s1975_s9 = smov 0   ;;  %s1977_s10 = smov 0  }
   0x5   :  { %s1979_s11 = smov 0   ;;  %s1981_s12 = smov 0  }
   0x6 LB: > { %s1996_s13 = sadd.s32 4294967295, %s1944_s12   ;;  %s1527_s14 = sadd.s32 4294967294, %s1944_s12   ;;  %s1944_s12 = sphi %s1981_s12, %s2349_s12   ;;  %s1940_s11 = sphi %s1979_s11, %s2348_s11   ;;  %s1936_s10 = sphi %s1977_s10, %s2347_s10   ;;  %s1932_s9 = sphi %s1975_s9, %s2346_s9  }
   0x7   : > { %p39_p0 = scmp.ne.s32.totalorder %s1936_s10, %s1932_s9  ;;  %p2326_p1 = scmp.eq.s32.totalorder %s1996_s13, 0 }
   0x8   : > { %p90_p3 = scmp.eq.s32.totalorder %s1527_s14, 1  ;;  %p1528_p5 = scmp.ge.s32.totalorder %s1944_s12, 1 }
   0x9   : > { %p2005_p4 = por %p2326_p1, %p39_p0  ;;  %p97_p7 = scmp.lt.s32.totalorder %s1944_s12, 3 }
   0xa   : > { %p2010_p6 = por %p90_p3, %p39_p0  ;;  %s1946_s18 = smov [#allocation5]  }
   0xb   : > { %s2330_s15 = scalar_select %p2005_p4, 1, 0 }
   0xc   : > { %s2331_s16 = scalar_select %p2010_p6, 1, 0 }
   0xd   : > { %p2015_p8 = pnand %p1528_p5, %p97_p7  ;;  %s109_s19 = sshll.u32 %s1946_s18, 4  ;;  %s110_s19 = int_to_ptr.vmem [resolvable:$true] %s109_s19 }
   0xe   : > { %s2029_s21 = sadd.s32 1, %s1944_s12   ;;  %s26_s22 = sadd.s32 1, %s1940_s11 }
   0xf   : > { %s2332_s17 = scalar_select %p2015_p8, 1, 0 }
  0x10   : > { %p1723_p9 = pneg %p2015_p8  ;;  %s23_s23 = ssub.s32 %s1944_s12, %s2029_s21 }
  0x11   : > { %s1833_s24 = scalar_lea.vmem %s110_s19, 256  ;;  %p1841_p5 = scmp.lt.s32.totalorder %s110_s19, %s110_s19 }
  0x12   : > { %p2024_p11 = pnand %p1723_p9, %p2326_p1  ;;  %p1834_p13 = scmp.ne.s32.totalorder %s110_s19, %s1833_s24 }
  0x13   : > { %p1842_p7 = scmp.lt.s32.totalorder %s1833_s24, %s1833_s24 }
  0x14   : > { %p1824_p12 = pneg %p2024_p11 }
  0x15   : > { %p1843_p10 = por %p1842_p7, %p1841_p5 }
  0x16   : > { %p1836_p0 = pnand %p1834_p13, %p1824_p12 }
  0x18   : > { %p1837_p3 = pneg %p1836_p0 }
  0x1a   : > { %p1844_p2 = pnand %p1843_p10, %p1837_p3 }
  0x1c   : > { %1847 = shalt.err (!%p1844_p2)
}
  0x1d   : > { %s1947_s25 = smov 64   ;;  %s1948_s26 = smov 4  }
  0x1e   : > { %1726 = dma.hbm_to_vmem [thread:$0]  (!%p2024_p11), %s2324_s1, 256, %s110_s19, [#allocation6], %s1947_s25, %s1947_s25, %s1948_s26  }
  0x1f   : > { %p24_p2 = scmp.eq.s32.totalorder %s23_s23, 0  ;;  %p33_p9 = scmp.ne.s32.totalorder %s1940_s11, %s1936_s10 }
  0x20   : > { %p34_p10 = scmp.eq.s32.totalorder %s1944_s12, 0  ;;  %p1736_p12 = scmp.lt.s32.totalorder %s1944_s12, 2 }
  0x21   : > { %s2049_s29 = scalar_select %p24_p2, %s1940_s11, %s26_s22  }
  0x22   : > { %p35_p13 = por %p34_p10, %p33_p9  ;;  %p2334_p0 = scmp.eq.s32.totalorder %s1996_s13, 1 }
  0x23   : > { %s123_s3 = sand.u32 1, %s1940_s11   ;;  %s1568_s4 = sshll.u32 %s1944_s12, 9 }
  0x24   : > { %p2053_p3 = por %p2334_p0, %p33_p9  ;;  %s1531_s5 = sshll.u32 %s123_s3, 5 }
  0x25   : > { %s2062_s8 = scalar_lea.hbm %s2323_s0, %s1568_s4  ;;  %s127_s14 = scalar_lea.vmem [#allocation2], %s1531_s5 }
  0x26   : > { %s2335_s30 = scalar_select %p2053_p3, 1, 0 }
  0x27   : > { %s134_s18 = sshll.u32 %s127_s14, 4  ;;  %p2064_p11 = pnand %p1736_p12, %p35_p13  ;;  %s2068_s18 = int_to_ptr.vmem [resolvable:$true] %s134_s18 }
  0x28   : > { %s2070_s20 = scalar_lea.sflag [#allocation3], %s123_s3  ;;  %s1848_s22 = scalar_lea.hbm %s2062_s8, 512 }
  0x29   : > { %p1849_p5 = scmp.ne.s32.totalorder %s2062_s8, %s1848_s22  ;;  %p1850_p7 = pneg %p2064_p11 }
  0x2a   : > { %s1853_s27 = scalar_lea.hbm %s2323_s0, 1024  ;;  %p1854_p10 = scmp.lt.s32.totalorder %s2062_s8, %s2323_s0 }
  0x2b   : > { %p1851_p2 = pnand %p1850_p7, %p1849_p5  ;;  %p1855_p12 = scmp.lt.s32.totalorder %s1853_s27, %s1848_s22 }
  0x2d   : > { %p1852_p9 = pneg %p1851_p2  ;;  %p1856_p13 = por %p1855_p12, %p1854_p10 }
  0x2f   : > { %p1857_p0 = pnand %p1856_p13, %p1852_p9 }
  0x31   : > { %1860 = shalt.err (!%p1857_p0)
}
  0x32   : > { %s1861_s3 = scalar_lea.vmem %s2068_s18, 512  ;;  %s1949_s5 = smov [#allocation2]  }
  0x33   : > { %p1862_p1 = scmp.ne.s32.totalorder %s2068_s18, %s1861_s3  ;;  %s1866_s6 = sshll.u32 %s1949_s5, 4  ;;  %s1867_s6 = int_to_ptr.vmem [resolvable:$false] %s1866_s6 }
  0x34   : > { %s1868_s7 = scalar_lea.vmem %s1867_s6, 1024  ;;  %p1869_p2 = scmp.lt.s32.totalorder %s2068_s18, %s1867_s6 }
  0x35   : > { %p1864_p6 = pnand %p1862_p1, %p1850_p7  ;;  %p1870_p3 = scmp.lt.s32.totalorder %s1868_s7, %s1861_s3 }
  0x37   : > { %p1865_p5 = pneg %p1864_p6  ;;  %p1871_p4 = por %p1870_p3, %p1869_p2 }
  0x39   : > { %p1872_p8 = pnand %p1871_p4, %p1865_p5 }
  0x3b   : > { %1875 = shalt.err (!%p1872_p8)
}
  0x3c   : > { %1730 = dma.hbm_to_vmem [thread:$0]  (!%p2064_p11), %s2062_s8, 512, %s2068_s18, %s2070_s20, %s1947_s25, %s1947_s25, %s1948_s26  }
  0x3d   : > { %p2337_p1 = scmp.ne.s32.totalorder %s2332_s17, 0 }
  0x3e   : > { %s2097_s14 = sand.u32 (!%p2337_p1), 1, %s1936_s10   ;;  %p2338_p4 = scmp.ne.s32.totalorder (!%p2337_p1), %s2330_s15, 0 }
  0x3f   : > { %146 = sbr.rel (%p2337_p1) target bundleno = 1110 (0x456), region = 28  ;;  %s1535_s22 = sshll.u32 (!%p2337_p1), %s2097_s14, 5 }
  0x40   : > { %s149_s23 = scalar_lea.sflag (!%p2337_p1), [#allocation3], %s2097_s14  ;;  %s152_s24 = scalar_lea.vmem (!%p2337_p1), [#allocation2], %s1535_s22 }
  0x44   : > { %1919 = dma.done.wait (%p2338_p4), %s149_s23, 512  }
  0x45   : > { %1921 = vsyncadd (%p2338_p4), %s149_s23, 4294966784  ;;  %p2339_p6 = scmp.eq.s32.totalorder %s1996_s13, 0 }
  0x47   : > { %1923 = dma.done.wait (%p2339_p6), [#allocation6], 256   ;;  %p2340_p8 = pmov %p2339_p6 }
  0x48   : > { %v1784_v0 = vld [vmem:[#allocation5 + $0x8] sm:$0xff]   ;;  %v1785_v1 = vld [vmem:[#allocation5] sm:$0xff]   ;;  %vm222_vm0 = vcmask 261120   ;;  %v1788_v4 = vld [vmem:[%s152_s24 + $0x10] sm:$0xff]   ;;  %v1950_v6 = vmov 0.0   ;;  %vm1951_vm1 = vmmov 0   ;;  %v701_v43 = vlaneseq }
  0x49   : > { %1925 = vsyncadd (%p2340_p8), [#allocation6], 4294967040  ;;  %1607 = vmatprep.subr.bf16.mxu0 %v1784_v0  ;;  %v1786_v2 = vld [vmem:[%s152_s24] sm:$0xff]   ;;  %v1787_v3 = vld [vmem:[%s152_s24 + $0x8] sm:$0xff]   ;;  %1619 = vmatprep.subr.bf16.mxu1 %v1950_v6  ;;  %s1952_s15 = smov 112   ;;  %s1953_s17 = smov 96  }
  0x4a   : > { %1608 = vmatpush3.bf16.msra.mxu0 %v1784_v0  ;;  %1611 = vmatprep.mubr.msk.bf16.mxu0 %vm222_vm0, %v1786_v2  ;;  %v1789_v5 = vld [vmem:[%s152_s24 + $0x18] sm:$0xff]   ;;  %vm311_vm2 = vcmask 130048   ;;  %vm898_vm3 = vcmask 1043456   ;;  %v702_v44 = vshrl.u32 %v701_v43, 7  ;;  %v704_v45 = vand.u32 127, %v701_v43  ;;  %s1537_s25 = sshll.u32 %s2097_s14, 3 }
  0x4b   : > { %1609 = vmatprep.subr.bf16.mxu0 %v1785_v1  ;;  %1621 = vmatprep.mubr.msk.bf16.mxu1 %vm1951_vm1, %v1950_v6  ;;  %vm716_vm5 = vcmask 64512   ;;  %s2268_s26 = scalar_lea.vmem [#allocation7], %s1537_s25  ;;  %s1954_s8 = smov 16   ;;  %vm1395_vm6 = vcmask 261248   ;;  %vm1401_vm7 = vcmask 392448   ;;  %vm1407_vm8 = vcmask 523648  }
  0x4c   : > { %vm2185_vm4 = vcmp.le.s32.totalorder %v702_v44, %v704_v45  ;;  %s1955_s18 = smov 32   ;;  %s1956_s19 = smov 48   ;;  %vm1413_vm9 = vcmask 654848   ;;  %vm1419_vm10 = vcmask 786048   ;;  %vm1425_vm11 = vcmask 917248  }
  0x4d   : > { %s1957_s20 = smov 64   ;;  %s1958_s27 = smov 80   ;;  %vm1431_vm12 = vcmask 1048448  }
  0x4e   : > { %1610 = vmatpush3.bf16.msra.mxu0 %v1785_v1  ;;  %s1565_s28 = sshll.u32 %s1996_s13, 7  ;;  %s1447_s4 = sshll.u32 %s2268_s26, 4  ;;  %s1448_s4 = int_to_ptr.vmem [resolvable:$true] %s1447_s4 }
  0x4f   : > { %1631 = vmatprep.subr.bf16.mxu0 %v1950_v6  ;;  %s2285_s6 = scalar_lea.hbm %s2325_s2, %s1565_s28  ;;  %s1434_s7 = scalar_lea.sflag [#allocation4], %s2097_s14 }
  0x50   : > { %s1876_s22 = scalar_lea.vmem %s1448_s4, 128  ;;  %p2343_p11 = scmp.ne.s32.totalorder %s2335_s30, 0 }
  0x51   : > { %1612 = vmatmul.mubr.msk.bf16.vlgmr.msra.gmra.mxu0 %vm222_vm0, %v1787_v3  ;;  %p1877_p3 = scmp.ne.s32.totalorder %s1448_s4, %s1876_s22  ;;  %s1959_s23 = smov [#allocation7]  }
  0x52   : > { %1615 = vmatprep.mubr.msk.bf16.mxu0 %vm222_vm0, %v1788_v4  ;;  %s1880_s24 = sshll.u32 %s1959_s23, 4  ;;  %s1881_s24 = int_to_ptr.vmem [resolvable:$false] %s1880_s24 }
  0x53   : > { %p1878_p7 = pnand %p1877_p3, %p2343_p11  ;;  %s1882_s13 = scalar_lea.vmem %s1881_s24, 256 }
  0x54   : > { %p1883_p10 = scmp.lt.s32.totalorder %s1448_s4, %s1881_s24  ;;  %p1884_p12 = scmp.lt.s32.totalorder %s1882_s13, %s1876_s22 }
  0x55   : > { %p1879_p9 = pneg %p1878_p7 }
  0x56   : > { %p1885_p13 = por %p1884_p12, %p1883_p10 }
  0x58   : > { %p1886_p0 = pnand %p1885_p13, %p1879_p9 }
  0x59   : > { %1616 = vmatmul.mubr.msk.bf16.gmra.mxu0 %vm222_vm0, %v1789_v5 }
  0x5a   : > { %1633 = vmatprep.mubr.msk.bf16.mxu0 %vm1951_vm1, %v1950_v6 }
 0x111   : > { %v1613_v7 = vpop.f32.mrf.mxu0 }
 0x112   : > { %v302_v8 = vpack.c.bf16 %v1613_v7, %v1613_v7 }
 0x113   : > { %v269_v9 = vpop.f32.mrf.mxu0 }
 0x114   : > { %v300_v10 = vpack.c.bf16 %v269_v9, %v269_v9  ;;  %408 = vrot.lane.b32.xlu1 %v302_v8, %s1952_s15 }
 0x115   : > { %v1614_v11 = vpop.f32.mrf.mxu0 }
 0x116   : > { %v2116_v12 = vpack.c.bf16 %v1614_v11, %v1614_v11  ;;  %309 = vrot.lane.b32.xlu0 %v300_v10, %s1952_s15 }
 0x117   : > { %v272_v13 = vpop.f32.mrf.mxu0 }
 0x118   : > { %v301_v14 = vpack.c.bf16 %v272_v13, %v272_v13  ;;  %457 = vrot.lane.b32.xlu1 %v2116_v12, %s1952_s15 }
 0x119   : > { %v1617_v15 = vpop.f32.mrf.mxu0 }
 0x11a   : > { %359 = vrot.lane.b32.xlu0 %v301_v14, %s1952_s15  ;;  %v306_v19 = vpack.c.bf16 %v1617_v15, %v1617_v15 }
 0x11b   : > { %v285_v16 = vpop.f32.mrf.mxu0 }
 0x11c   : > { %v304_v17 = vpack.c.bf16 %v285_v16, %v285_v16 }
 0x11d   : > { %v1618_v18 = vpop.f32.mrf.mxu0 }
 0x11e   : > { %506 = vrot.lane.b32.xlu0 %v304_v17, %s1952_s15  ;;  %v2123_v22 = vpack.c.bf16 %v1618_v18, %v1618_v18 }
 0x11f   : > { %v288_v20 = vpop.f32.mrf.mxu0 }
 0x120   : > { %v305_v21 = vpack.c.bf16 %v288_v20, %v288_v20 }
 0x122   : > { %604 = vrot.lane.b32.xlu0 %v306_v19, %s1952_s15  ;;  %555 = vrot.lane.b32.xlu1 %v305_v21, %s1952_s15 }
 0x126   : > { %893 = vrot.lane.b32.xlu0 %v300_v10, %s1953_s17  ;;  %653 = vrot.lane.b32.xlu1 %v2123_v22, %s1952_s15 }
 0x12a   : > { %1022 = vrot.lane.b32.xlu0 %v302_v8, %s1953_s17  ;;  %958 = vrot.lane.b32.xlu1 %v301_v14, %s1953_s17 }
 0x12e   : > { %1150 = vrot.lane.b32.xlu0 %v304_v17, %s1953_s17  ;;  %1086 = vrot.lane.b32.xlu1 %v2116_v12, %s1953_s17 }
 0x132   : > { %1278 = vrot.lane.b32.xlu0 %v306_v19, %s1953_s17  ;;  %1342 = vrot.lane.b32.xlu1 %v2123_v22, %s1953_s17 }
 0x136   : > { %1214 = vrot.lane.b32.xlu1 %v305_v21, %s1953_s17 }
 0x186   : > { %v409_v23 = vpop.permute.xlu1 %408 }
 0x187   : > { %v414_v24 = vsel %vm311_vm2, %v409_v23, 0 }
 0x188   : > { %1632 = vmatpush3.bf16.xpose.msra.mxu0 %v414_v24  ;;  %v310_v25 = vpop.permute.xlu0 %309 }
 0x189   : > { %v316_v26 = vsel %vm311_vm2, %v310_v25, 0  ;;  %1643 = vmatprep.subr.bf16.mxu0 %v1950_v6 }
 0x18a   : > { %1620 = vmatpush3.bf16.xpose.msra.mxu1 %v316_v26  ;;  %v458_v31 = vpop.permute.xlu1 %457 }
 0x18b   : > { %1625 = vmatprep.subr.bf16.mxu1 %v1950_v6  ;;  %v463_v34 = vsel %vm311_vm2, %v458_v31, 0 }
 0x18c   : > { %v360_v27 = vpop.permute.xlu0 %359 }
 0x18d   : > { %v365_v29 = vsel %vm311_vm2, %v360_v27, 0 }
 0x18f   : > { %1634 = vmatmul.mubr.msk.bf16.vlgmr.msra.gmra.mxu0 %vm311_vm2, %v302_v8 }
 0x190   : > { %v507_v28 = vpop.permute.xlu0 %506  ;;  %1645 = vmatprep.mubr.msk.bf16.mxu0 %vm1951_vm1, %v1950_v6 }
 0x191   : > { %v512_v30 = vsel %vm311_vm2, %v507_v28, 0  ;;  %1622 = vmatmul.mubr.msk.bf16.vlgmr.msra.gmra.mxu1 %vm311_vm2, %v300_v10 }
 0x192   : > { %1626 = vmatpush3.bf16.xpose.msra.mxu1 %v365_v29  ;;  %1644 = vmatpush3.bf16.xpose.msra.mxu0 %v512_v30 }
 0x193   : > { %1627 = vmatprep.mubr.msk.bf16.mxu1 %vm1951_vm1, %v1950_v6  ;;  %1637 = vmatprep.subr.bf16.mxu1 %v1950_v6 }
 0x194   : > { %1655 = vmatprep.subr.bf16.mxu0 %v1950_v6  ;;  %v605_v32 = vpop.permute.xlu0 %604  ;;  %v556_v36 = vpop.permute.xlu1 %555 }
 0x195   : > { %v610_v33 = vsel %vm311_vm2, %v605_v32, 0  ;;  %v561_v37 = vsel %vm311_vm2, %v556_v36, 0 }
 0x198   : > { %v894_v35 = vpop.permute.xlu0 %893  ;;  %v654_v39 = vpop.permute.xlu1 %653 }
 0x199   : > { %1628 = vmatmul.mubr.msk.bf16.vlgmr.msra.gmra.mxu1 %vm311_vm2, %v301_v14  ;;  %1646 = vmatmul.mubr.msk.bf16.vlgmr.msra.gmra.mxu0 %vm311_vm2, %v304_v17  ;;  %v900_v38 = vsel %vm898_vm3, %v894_v35, 0  ;;  %v659_v40 = vsel %vm311_vm2, %v654_v39, 0 }
 0x19a   : > { %1638 = vmatpush3.bf16.xpose.msra.mxu1 %v463_v34  ;;  %1656 = vmatpush3.bf16.xpose.msra.mxu0 %v610_v33 }
 0x19b   : > { %1639 = vmatprep.mubr.msk.bf16.mxu1 %vm1951_vm1, %v1950_v6  ;;  %1657 = vmatprep.mubr.msk.bf16.mxu0 %vm1951_vm1, %v1950_v6 }
 0x19c   : > { %1649 = vmatprep.subr.bf16.mxu1 %v1950_v6  ;;  %1667 = vmatprep.subr.bf16.mxu0 %v1950_v6  ;;  %v959_v41 = vpop.permute.xlu1 %958 }
 0x19d   : > { %v964_v42 = vsel %vm898_vm3, %v959_v41, 0 }
 0x1a1   : > { %1640 = vmatmul.mubr.msk.bf16.vlgmr.msra.gmra.mxu1 %vm311_vm2, %v2116_v12  ;;  %1658 = vmatmul.mubr.msk.bf16.vlgmr.msra.gmra.mxu0 %vm311_vm2, %v306_v19 }
 0x1a2   : > { %1650 = vmatpush3.bf16.xpose.msra.mxu1 %v561_v37  ;;  %1668 = vmatpush3.bf16.msra.mxu0 %v900_v38 }
 0x1a3   : > { %1651 = vmatprep.mubr.msk.bf16.mxu1 %vm1951_vm1, %v1950_v6  ;;  %1661 = vmatprep.subr.bf16.mxu1 %v1950_v6 }
 0x1a4   : > { %1669 = vmatprep.mubr.msk.bf16.mxu0 %vm1951_vm1, %v1950_v6  ;;  %1679 = vmatprep.subr.bf16.mxu0 %v1950_v6 }
 0x1a9   : > { %1652 = vmatmul.mubr.msk.bf16.vlgmr.msra.gmra.mxu1 %vm311_vm2, %v305_v21 }
 0x1aa   : > { %1662 = vmatpush3.bf16.xpose.msra.mxu1 %v659_v40  ;;  %1663 = vmatprep.mubr.msk.bf16.mxu1 %vm1951_vm1, %v1950_v6 }
 0x1ab   : > { %1673 = vmatprep.subr.bf16.mxu1 %v1950_v6 }
 0x1b1   : > { %1664 = vmatmul.mubr.msk.bf16.vlgmr.msra.gmra.mxu1 %vm311_vm2, %v2123_v22 }
 0x1b2   : > { %1674 = vmatpush3.bf16.msra.mxu1 %v964_v42  ;;  %1675 = vmatprep.mubr.msk.bf16.mxu1 %vm1951_vm1, %v1950_v6 }
 0x1b3   : > { %1685 = vmatprep.subr.bf16.mxu1 %v1950_v6 }
 0x24f   : > { %v450_v47 = vpop.f32.mrf.mxu0 }
 0x250   : > { %v710_v48 = vsel %vm2185_vm4, %v450_v47, -inf }
 0x251   : > { %v731_v49 = vsel %vm716_vm5, %v710_v48, -inf  ;;  %v352_v50 = vpop.f32.mrf.mxu1  ;;  %v1635_v51 = vpop.f32.mrf.mxu0 }
 0x252   : > { %v732_v52 = vrot.slane %v731_v49, 4  ;;  %v708_v53 = vsel %vm2185_vm4, %v352_v50, -inf }
 0x253   : > { %v717_v54 = vsel %vm716_vm5, %v708_v53, -inf  ;;  %v1623_v55 = vpop.f32.mrf.mxu1  ;;  %v453_v56 = vpop.f32.mrf.mxu0 }
 0x254   : > { %v733_v57 = vmax.f32 %v731_v49, %v732_v52  ;;  %v718_v58 = vrot.slane %v717_v54, 4 }
 0x255   : > { %v355_v59 = vpop.f32.mrf.mxu1  ;;  %v1636_v60 = vpop.f32.mrf.mxu0 }
 0x256   : > { %v734_v61 = vrot.slane %v733_v57, 2  ;;  %v719_v62 = vmax.f32 %v717_v54, %v718_v58 }
 0x257   : > { %v1624_v63 = vpop.f32.mrf.mxu1 }
 0x258   : > { %v735_v0 = vmax.f32 %v733_v57, %v734_v61  ;;  %v720_v1 = vrot.slane %v719_v62, 2 }
 0x259   : > { %v401_v2 = vpop.f32.mrf.mxu1  ;;  %v548_v3 = vpop.f32.mrf.mxu0 }
 0x25a   : > { %v736_v4 = vrot.slane %v735_v0, 1  ;;  %v721_v5 = vmax.f32 %v719_v62, %v720_v1  ;;  %v709_v7 = vsel %vm2185_vm4, %v401_v2, -inf  ;;  %v712_v8 = vsel %vm2185_vm4, %v548_v3, -inf }
 0x25b   : > { %v724_v9 = vsel %vm716_vm5, %v709_v7, -inf  ;;  %v745_v10 = vsel %vm716_vm5, %v712_v8, -inf  ;;  %v1629_v11 = vpop.f32.mrf.mxu1  ;;  %v1647_v12 = vpop.f32.mrf.mxu0 }
 0x25c   : > { %v737_v13 = vmax.f32 %v735_v0, %v736_v4  ;;  %v722_v14 = vrot.slane %v721_v5, 1  ;;  %v725_v15 = vrot.slane %v724_v9, 4  ;;  %v746_v16 = vrot.slane %v745_v10, 4 }
 0x25d   : > { %v404_v17 = vpop.f32.mrf.mxu1  ;;  %v551_v18 = vpop.f32.mrf.mxu0 }
 0x25e   : > { %v775_v19 = vsub.f32 %v710_v48, %v737_v13  ;;  %v723_v20 = vmax.f32 %v721_v5, %v722_v14  ;;  %v726_v21 = vmax.f32 %v724_v9, %v725_v15  ;;  %v747_v22 = vmax.f32 %v745_v10, %v746_v16 }
 0x25f   : > { %v1630_v23 = vpop.f32.mrf.mxu1  ;;  %v1648_v24 = vpop.f32.mrf.mxu0 }
 0x260   : > { %v785_v25 = vmul.f32 1.442695, %v775_v19  ;;  %v773_v26 = vsub.f32 %v708_v53, %v723_v20  ;;  %v727_v27 = vrot.slane %v726_v21, 2  ;;  %v748_v28 = vrot.slane %v747_v22, 2 }
 0x261   : > { %v499_v29 = vpop.f32.mrf.mxu1  ;;  %v646_v30 = vpop.f32.mrf.mxu0 }
 0x262   : > { %1790 = vpow2.f32 %v785_v25  ;;  %v781_v31 = vmul.f32 1.442695, %v773_v26  ;;  %v728_v32 = vmax.f32 %v726_v21, %v727_v27  ;;  %v749_v33 = vmax.f32 %v747_v22, %v748_v28 }
 0x263   : > { %v711_v34 = vsel %vm2185_vm4, %v499_v29, -inf  ;;  %v714_v35 = vsel %vm2185_vm4, %v646_v30, -inf  ;;  %v1641_v36 = vpop.f32.mrf.mxu1  ;;  %v1659_v37 = vpop.f32.mrf.mxu0 }
 0x264   : > { %1792 = vpow2.f32 %v781_v31  ;;  %v729_v38 = vrot.slane %v728_v32, 1  ;;  %v750_v39 = vrot.slane %v749_v33, 1  ;;  %v738_v40 = vsel %vm716_vm5, %v711_v34, -inf }
 0x265   : > { %v739_v41 = vrot.slane %v738_v40, 4  ;;  %v759_v42 = vsel %vm716_vm5, %v714_v35, -inf  ;;  %v502_v43 = vpop.f32.mrf.mxu1  ;;  %v649_v44 = vpop.f32.mrf.mxu0 }
 0x266   : > { %v730_v45 = vmax.f32 %v728_v32, %v729_v38  ;;  %v751_v47 = vmax.f32 %v749_v33, %v750_v39  ;;  %v760_v48 = vrot.slane %v759_v42, 4 }
 0x267   : > { %v740_v49 = vmax.f32 %v738_v40, %v739_v41  ;;  %v1642_v50 = vpop.f32.mrf.mxu1  ;;  %v1660_v51 = vpop.f32.mrf.mxu0 }
 0x268   : > { %v774_v52 = vsub.f32 %v709_v7, %v730_v45  ;;  %v777_v53 = vsub.f32 %v712_v8, %v751_v47  ;;  %v761_v54 = vmax.f32 %v759_v42, %v760_v48 }
 0x269   : > { %v741_v55 = vrot.slane %v740_v49, 2  ;;  %v597_v56 = vpop.f32.mrf.mxu1 }
 0x26a   : > { %v783_v57 = vmul.f32 1.442695, %v774_v52  ;;  %v789_v58 = vmul.f32 1.442695, %v777_v53  ;;  %v762_v59 = vrot.slane %v761_v54, 2  ;;  %v713_v60 = vsel %vm2185_vm4, %v597_v56, -inf }
 0x26b   : > { %v742_v61 = vmax.f32 %v740_v49, %v741_v55  ;;  %v752_v62 = vsel %vm716_vm5, %v713_v60, -inf  ;;  %v1653_v63 = vpop.f32.mrf.mxu1 }
 0x26c   : > { %1794 = vpow2.f32 %v783_v57  ;;  %v763_v0 = vmax.f32 %v761_v54, %v762_v59  ;;  %v753_v1 = vrot.slane %v752_v62, 4 }
 0x26d   : > { %1796 = vpow2.f32 %v789_v58  ;;  %v743_v2 = vrot.slane %v742_v61, 1  ;;  %v600_v3 = vpop.f32.mrf.mxu1 }
 0x26e   : > { %v764_v4 = vrot.slane %v763_v0, 1  ;;  %v754_v5 = vmax.f32 %v752_v62, %v753_v1 }
 0x26f   : > { %v2210_v7 = vpop.eup %1790  ;;  %v744_v8 = vmax.f32 %v742_v61, %v743_v2  ;;  %v1654_v9 = vpop.f32.mrf.mxu1 }
 0x270   : > { %v811_v10 = vsel %vm716_vm5, %v2210_v7, 0.0  ;;  %v765_v11 = vmax.f32 %v763_v0, %v764_v4  ;;  %v755_v12 = vrot.slane %v754_v5, 2 }
 0x271   : > { %v2214_v13 = vpop.eup %1792  ;;  %v812_v14 = vrot.slane %v811_v10, 4  ;;  %v776_v15 = vsub.f32 %v711_v34, %v744_v8  ;;  %v695_v16 = vpop.f32.mrf.mxu1 }
 0x272   : > { %v797_v17 = vsel %vm716_vm5, %v2214_v13, 0.0  ;;  %v779_v18 = vsub.f32 %v714_v35, %v765_v11  ;;  %v756_v19 = vmax.f32 %v754_v5, %v755_v12  ;;  %v715_v20 = vsel %vm2185_vm4, %v695_v16, -inf }
 0x273   : > { %v813_v21 = vadd.f32 %v812_v14, %v811_v10  ;;  %v798_v22 = vrot.slane %v797_v17, 4  ;;  %v787_v23 = vmul.f32 1.442695, %v776_v15  ;;  %v766_v24 = vsel %vm716_vm5, %v715_v20, -inf  ;;  %v1665_v25 = vpop.f32.mrf.mxu1 }
 0x274   : > { %v793_v26 = vmul.f32 1.442695, %v779_v18  ;;  %v757_v27 = vrot.slane %v756_v19, 1  ;;  %v767_v28 = vrot.slane %v766_v24, 4 }
 0x275   : > { %v814_v29 = vrot.slane %v813_v21, 2  ;;  %v799_v30 = vadd.f32 %v798_v22, %v797_v17  ;;  %1798 = vpow2.f32 %v787_v23  ;;  %v698_v31 = vpop.f32.mrf.mxu1 }
 0x276   : > { %1800 = vpow2.f32 %v793_v26  ;;  %v758_v32 = vmax.f32 %v756_v19, %v757_v27  ;;  %v768_v33 = vmax.f32 %v766_v24, %v767_v28 }
 0x277   : > { %v800_v34 = vrot.slane %v799_v30, 2  ;;  %v1666_v35 = vpop.f32.mrf.mxu1  ;;  %v815_v46 = vadd.f32 %v814_v29, %v813_v21 }
 0x278   : > { %v778_v36 = vsub.f32 %v713_v60, %v758_v32  ;;  %v769_v37 = vrot.slane %v768_v33, 2 }
 0x279   : > { %v2221_v38 = vpop.eup %1794  ;;  %v801_v39 = vadd.f32 %v800_v34, %v799_v30  ;;  %v816_v40 = vrot.slane %v815_v46, 1 }
 0x27a   : > { %v2223_v41 = vpop.eup %1796  ;;  %v804_v42 = vsel %vm716_vm5, %v2221_v38, 0.0  ;;  %v791_v43 = vmul.f32 1.442695, %v778_v36  ;;  %v770_v44 = vmax.f32 %v768_v33, %v769_v37 }
 0x27b   : > { %v805_v45 = vrot.slane %v804_v42, 4  ;;  %v825_v47 = vsel %vm716_vm5, %v2223_v41, 0.0  ;;  %v802_v48 = vrot.slane %v801_v39, 1  ;;  %v817_v49 = vadd.f32 %v816_v40, %v815_v46 }
 0x27c   : > { %v826_v50 = vrot.slane %v825_v47, 4  ;;  %1802 = vpow2.f32 %v791_v43  ;;  %v771_v51 = vrot.slane %v770_v44, 1 }
 0x27d   : > { %v806_v52 = vadd.f32 %v805_v45, %v804_v42  ;;  %v803_v53 = vadd.f32 %v802_v48, %v801_v39  ;;  %1804 = vrcp.f32 %v817_v49 }
 0x27e   : > { %v827_v54 = vadd.f32 %v826_v50, %v825_v47  ;;  %v772_v55 = vmax.f32 %v770_v44, %v771_v51 }
 0x27f   : > { %v807_v56 = vrot.slane %v806_v52, 2  ;;  %1806 = vrcp.f32 %v803_v53 }
 0x280   : > { %v828_v57 = vrot.slane %v827_v54, 2  ;;  %v780_v58 = vsub.f32 %v715_v20, %v772_v55 }
 0x281   : > { %v808_v59 = vadd.f32 %v807_v56, %v806_v52 }
 0x282   : > { %v1799_v60 = vpop.eup %1798  ;;  %v795_v61 = vmul.f32 1.442695, %v780_v58  ;;  %v829_v62 = vadd.f32 %v828_v57, %v827_v54 }
 0x283   : > { %v1801_v63 = vpop.eup %1800  ;;  %v818_v0 = vsel %vm716_vm5, %v1799_v60, 0.0  ;;  %v809_v1 = vrot.slane %v808_v59, 1 }
 0x284   : > { %v819_v2 = vrot.slane %v818_v0, 4  ;;  %v839_v3 = vsel %vm716_vm5, %v1801_v63, 0.0  ;;  %1808 = vpow2.f32 %v795_v61  ;;  %v830_v4 = vrot.slane %v829_v62, 1 }
 0x285   : > { %v840_v5 = vrot.slane %v839_v3, 4  ;;  %v810_v8 = vadd.f32 %v809_v1, %v808_v59  ;;  %v1023_v59 = vpop.permute.xlu0 %1022 }
 0x286   : > { %v820_v9 = vadd.f32 %v819_v2, %v818_v0  ;;  %v831_v10 = vadd.f32 %v830_v4, %v829_v62  ;;  %v1087_v62 = vpop.permute.xlu1 %1086 }
 0x287   : > { %v841_v11 = vadd.f32 %v840_v5, %v839_v3  ;;  %1810 = vrcp.f32 %v810_v8  ;;  %v1092_v8 = vsel %vm898_vm3, %v1087_v62, 0 }
 0x288   : > { %v821_v12 = vrot.slane %v820_v9, 2  ;;  %1812 = vrcp.f32 %v831_v10 }
 0x289   : > { %v1803_v14 = vpop.eup %1802  ;;  %v842_v15 = vrot.slane %v841_v11, 2  ;;  %v1151_v61 = vpop.permute.xlu0 %1150 }
 0x28a   : > { %v832_v16 = vsel %vm716_vm5, %v1803_v14, 0.0  ;;  %v822_v17 = vadd.f32 %v821_v12, %v820_v9  ;;  %v1805_v18 = vpop.eup %1804  ;;  %v1343_v1 = vpop.permute.xlu1 %1342  ;;  %v1156_v5 = vsel %vm898_vm3, %v1151_v61, 0 }
 0x28b   : > { %v833_v19 = vrot.slane %v832_v16, 4  ;;  %v843_v20 = vadd.f32 %v842_v15, %v841_v11  ;;  %v858_v29 = vmul.f32 %v1805_v18, %v2210_v7 }
 0x28c   : > { %v1807_v21 = vpop.eup %1806  ;;  %v823_v22 = vrot.slane %v822_v17, 1 }
 0x28d   : > { %v834_v23 = vadd.f32 %v833_v19, %v832_v16  ;;  %v854_v24 = vmul.f32 %v1807_v21, %v2214_v13  ;;  %v844_v25 = vrot.slane %v843_v20, 1  ;;  %v871_v35 = vpack.c.bf16 %v858_v29, %v858_v29  ;;  %v1279_v0 = vpop.permute.xlu0 %1278 }
 0x28e   : > { %v824_v26 = vadd.f32 %v823_v22, %v822_v17  ;;  %v1215_v2 = vpop.permute.xlu1 %1214  ;;  %v1284_v10 = vsel %vm898_vm3, %v1279_v0, 0  ;;  %v1348_v16 = vsel %vm898_vm3, %v1343_v1, 0 }
 0x28f   : > { %v835_v27 = vrot.slane %v834_v23, 2  ;;  %v869_v28 = vpack.c.bf16 %v854_v24, %v854_v24  ;;  %v845_v30 = vadd.f32 %v844_v25, %v843_v20  ;;  %v1220_v12 = vsel %vm898_vm3, %v1215_v2, 0 }
 0x290   : > { %1814 = vrcp.f32 %v824_v26 }
 0x291   : > { %v1809_v31 = vpop.eup %1808  ;;  %877 = vxpose.xlu0.c.b16.start.end [1/1] (short) (narrow) %v869_v28, 16  ;;  %1816 = vrcp.f32 %v845_v30  ;;  %v836_v32 = vadd.f32 %v835_v27, %v834_v23 }
 0x292   : > { %v846_v33 = vsel %vm716_vm5, %v1809_v31, 0.0 }
 0x293   : > { %v847_v34 = vrot.slane %v846_v33, 4  ;;  %v837_v46 = vrot.slane %v836_v32, 1 }
 0x294   : > { %v1811_v36 = vpop.eup %1810 }
 0x295   : > { %v1813_v37 = vpop.eup %1812  ;;  %v848_v13 = vadd.f32 %v847_v34, %v846_v33  ;;  %1006 = vxpose.xlu0.c.b16.start.end [1/1] (short) (narrow) %v871_v35, 16  ;;  %v856_v39 = vmul.f32 %v1811_v36, %v2221_v38  ;;  %v838_v40 = vadd.f32 %v837_v46, %v836_v32 }
 0x296   : > { %v862_v43 = vmul.f32 %v1813_v37, %v2223_v41 }
 0x297   : > { %v849_v42 = vrot.slane %v848_v13, 2  ;;  %v870_v7 = vpack.c.bf16 %v856_v39, %v856_v39  ;;  %1818 = vrcp.f32 %v838_v40 }
 0x298   : > { %v873_v45 = vpack.c.bf16 %v862_v43, %v862_v43 }
 0x299   : > { %942 = vxpose.xlu1.c.b16.start.end [1/1] (short) (narrow) %v870_v7, 16  ;;  %v850_v44 = vadd.f32 %v849_v42, %v848_v13 }
 0x29b   : > { %v851_v47 = vrot.slane %v850_v44, 1 }
 0x29d   : > { %v1815_v48 = vpop.eup %1814  ;;  %1134 = vxpose.xlu1.c.b16.start.end [1/1] (short) (narrow) %v873_v45, 16  ;;  %v852_v49 = vadd.f32 %v851_v47, %v850_v44 }
 0x29e   : > { %v1817_v50 = vpop.eup %1816  ;;  %v860_v51 = vmul.f32 %v1815_v48, %v1799_v60 }
 0x29f   : > { %v866_v52 = vmul.f32 %v1817_v50, %v1801_v63  ;;  %1820 = vrcp.f32 %v852_v49  ;;  %v1028_v63 = vsel %vm898_vm3, %v1023_v59, 0 }
 0x2a0   : > { %v872_v53 = vpack.c.bf16 %v860_v51, %v860_v51 }
 0x2a1   : > { %v875_v54 = vpack.c.bf16 %v866_v52, %v866_v52 }
 0x2a2   : > { %1070 = vxpose.xlu0.c.b16.start.end [1/1] (short) (narrow) %v872_v53, 16 }
 0x2a3   : > { %1262 = vxpose.xlu1.c.b16.start.end [1/1] (short) (narrow) %v875_v54, 16 }
 0x2a4   : > { %v1819_v38 = vpop.eup %1818 }
 0x2a5   : > { %v864_v55 = vmul.f32 %v1819_v38, %v1803_v14 }
 0x2a7   : > { %v874_v56 = vpack.c.bf16 %v864_v55, %v864_v55 }
 0x2a9   : > { %1198 = vxpose.xlu0.c.b16.start.end [1/1] (short) (narrow) %v874_v56, 16 }
 0x2ac   : > { %v1821_v41 = vpop.eup %1820 }
 0x2ad   : > { %v868_v57 = vmul.f32 %v1821_v41, %v1809_v31 }
 0x2af   : > { %v876_v58 = vpack.c.bf16 %v868_v57, %v868_v57 }
 0x2b1   : > { %1326 = vxpose.xlu0.c.b16.start.end [1/1] (short) (narrow) %v876_v58, 16 }
 0x2f3   : > { %v885_v60 = vpop.trf.xlu0 }
 0x2f4   : > { %1670 = vmatmul.mubr.msk.bf16.vlgmr.msra.gmra.mxu0 %vm716_vm5, %v885_v60 }
 0x2f5   : > { %1680 = vmatpush3.bf16.msra.mxu0 %v1028_v63  ;;  %1681 = vmatprep.mubr.msk.bf16.mxu0 %vm1951_vm1, %v1950_v6 }
 0x2f6   : > { %1691 = vmatprep.subr.bf16.mxu0 %v1950_v6 }
 0x2f7   : > { %v1014_v3 = vpop.trf.xlu0 }
 0x2fb   : > { %v950_v4 = vpop.trf.xlu1 }
 0x2fc   : > { %1676 = vmatmul.mubr.msk.bf16.vlgmr.msra.gmra.mxu1 %vm716_vm5, %v950_v4  ;;  %1682 = vmatmul.mubr.msk.bf16.vlgmr.msra.gmra.mxu0 %vm716_vm5, %v1014_v3 }
 0x2fd   : > { %1686 = vmatpush3.bf16.msra.mxu1 %v1092_v8  ;;  %1692 = vmatpush3.bf16.msra.mxu0 %v1156_v5 }
 0x2fe   : > { %1693 = vmatprep.mubr.msk.bf16.mxu0 %vm1951_vm1, %v1950_v6  ;;  %1703 = vmatprep.subr.bf16.mxu0 %v1950_v6 }
 0x2ff   : > { %1687 = vmatprep.mubr.msk.bf16.mxu1 %vm1951_vm1, %v1950_v6  ;;  %1697 = vmatprep.subr.bf16.mxu1 %v1950_v6  ;;  %v1142_v9 = vpop.trf.xlu1 }
 0x304   : > { %v1078_v11 = vpop.trf.xlu0  ;;  %1694 = vmatmul.mubr.msk.bf16.vlgmr.msra.gmra.mxu0 %vm716_vm5, %v1142_v9 }
 0x305   : > { %1688 = vmatmul.mubr.msk.bf16.vlgmr.msra.gmra.mxu1 %vm716_vm5, %v1078_v11  ;;  %1704 = vmatpush3.bf16.msra.mxu0 %v1284_v10  ;;  %v1270_v14 = vpop.trf.xlu1 }
 0x306   : > { %1698 = vmatpush3.bf16.msra.mxu1 %v1220_v12  ;;  %1699 = vmatprep.mubr.msk.bf16.mxu1 %vm1951_vm1, %v1950_v6 }
 0x307   : > { %1709 = vmatprep.subr.bf16.mxu1 %v1950_v6  ;;  %1705 = vmatprep.mubr.msk.bf16.mxu0 %vm1951_vm1, %v1950_v6 }
 0x30b   : > { %v1206_v15 = vpop.trf.xlu0 }
 0x30c   : > { %1706 = vmatmul.mubr.msk.bf16.vlgmr.msra.gmra.mxu0 %vm716_vm5, %v1270_v14 }
 0x30d   : > { %1700 = vmatmul.mubr.msk.bf16.vlgmr.msra.gmra.mxu1 %vm716_vm5, %v1206_v15 }
 0x30e   : > { %1710 = vmatpush3.bf16.msra.mxu1 %v1348_v16  ;;  %1711 = vmatprep.mubr.msk.bf16.mxu1 %vm1951_vm1, %v1950_v6 }
 0x313   : > { %v1334_v17 = vpop.trf.xlu0 }
 0x315   : > { %1712 = vmatmul.mubr.msk.bf16.vlgmr.msra.gmra.mxu1 %vm716_vm5, %v1334_v17 }
 0x3b4   : > { %v936_v18 = vpop.f32.mrf.mxu0 }
 0x3b5   : > { %1390 = vst.msk [vmem:[%s2268_s26] sm:$0xff] %vm311_vm2, %v936_v18 }
 0x3b6   : > { %v1671_v19 = vpop.f32.mrf.mxu0 }
 0x3b8   : > { %v939_v20 = vpop.f32.mrf.mxu0 }
 0x3ba   : > { %v1672_v21 = vpop.f32.mrf.mxu0 }
 0x3bc   : > { %v1000_v22 = vpop.f32.mrf.mxu1  ;;  %v1064_v23 = vpop.f32.mrf.mxu0 }
 0x3bd   : > { %1392 = vrot.lane.b32.xlu1 %v1000_v22, %s1954_s8  ;;  %1398 = vrot.lane.b32.xlu0 %v1064_v23, %s1955_s18 }
 0x3be   : > { %v1683_v6 = vpop.f32.mrf.mxu0  ;;  %v1677_v24 = vpop.f32.mrf.mxu1 }
 0x3c0   : > { %v1003_v25 = vpop.f32.mrf.mxu1  ;;  %v1067_v26 = vpop.f32.mrf.mxu0 }
 0x3c2   : > { %v1684_v27 = vpop.f32.mrf.mxu0  ;;  %v1678_v28 = vpop.f32.mrf.mxu1 }
 0x3c4   : > { %v1192_v29 = vpop.f32.mrf.mxu0 }
 0x3c5   : > { %v1128_v30 = vpop.f32.mrf.mxu1 }
 0x3c6   : > { %1404 = vrot.lane.b32.xlu1 %v1128_v30, %s1956_s19  ;;  %v1695_v31 = vpop.f32.mrf.mxu0 }
 0x3c7   : > { %v1689_v32 = vpop.f32.mrf.mxu1 }
 0x3c8   : > { %v1195_v33 = vpop.f32.mrf.mxu0 }
 0x3c9   : > { %v1131_v34 = vpop.f32.mrf.mxu1 }
 0x3ca   : > { %v1696_v35 = vpop.f32.mrf.mxu0  ;;  %1410 = vrot.lane.b32.xlu1 %v1192_v29, %s1957_s20 }
 0x3cb   : > { %v1690_v46 = vpop.f32.mrf.mxu1 }
 0x3cc   : > { %v1320_v36 = vpop.f32.mrf.mxu0 }
 0x3cd   : > { %v1256_v37 = vpop.f32.mrf.mxu1 }
 0x3ce   : > { %1416 = vrot.lane.b32.xlu0 %v1256_v37, %s1958_s27  ;;  %v1707_v13 = vpop.f32.mrf.mxu0  ;;  %1422 = vrot.lane.b32.xlu1 %v1320_v36, %s1953_s17 }
 0x3cf   : > { %v1701_v39 = vpop.f32.mrf.mxu1 }
 0x3d0   : > { %v1323_v40 = vpop.f32.mrf.mxu0 }
 0x3d1   : > { %v1259_v42 = vpop.f32.mrf.mxu1 }
 0x3d2   : > { %v1708_v7 = vpop.f32.mrf.mxu0 }
 0x3d3   : > { %v1702_v43 = vpop.f32.mrf.mxu1 }
 0x3d5   : > { %v1384_v44 = vpop.f32.mrf.mxu1 }
 0x3d6   : > { %1428 = vrot.lane.b32.xlu0 %v1384_v44, %s1952_s15 }
 0x3d7   : > { %v1713_v45 = vpop.f32.mrf.mxu1 }
 0x3d9   : > { %v1387_v47 = vpop.f32.mrf.mxu1 }
 0x3db   : > { %v1714_v48 = vpop.f32.mrf.mxu1 }
 0x42f   : > { %v1393_v49 = vpop.permute.xlu1 %1392  ;;  %v1399_v50 = vpop.permute.xlu0 %1398 }
 0x430   : > { %1396 = vst.msk [vmem:[%s2268_s26] sm:$0xff] %vm1395_vm6, %v1393_v49 }
 0x431   : > { %1402 = vst.msk [vmem:[%s2268_s26] sm:$0xff] %vm1401_vm7, %v1399_v50 }
 0x438   : > { %v1405_v51 = vpop.permute.xlu1 %1404 }
 0x439   : > { %1408 = vst.msk [vmem:[%s2268_s26] sm:$0xff] %vm1407_vm8, %v1405_v51 }
 0x43c   : > { %v1411_v52 = vpop.permute.xlu1 %1410 }
 0x43d   : > { %1414 = vst.msk [vmem:[%s2268_s26] sm:$0xff] %vm1413_vm9, %v1411_v52 }
 0x440   : > { %v1417_v53 = vpop.permute.xlu0 %1416  ;;  %v1423_v54 = vpop.permute.xlu1 %1422 }
 0x441   : > { %1420 = vst.msk [vmem:[%s2268_s26] sm:$0xff] %vm1419_vm10, %v1417_v53 }
 0x442   : > { %1426 = vst.msk [vmem:[%s2268_s26] sm:$0xff] %vm1425_vm11, %v1423_v54 }
 0x448   : > { %v1429_v38 = vpop.permute.xlu0 %1428 }
 0x449   : > { %1432 = vst.msk [vmem:[%s2268_s26] sm:$0xff] %vm1431_vm12, %v1429_v38 }
 0x44a   : > { %1889 = shalt.err (!%p1886_p0)
}
 0x44b   : > { %s1890_s15 = scalar_lea.hbm %s2285_s6, 128  ;;  %s1894_s25 = scalar_lea.hbm %s2325_s2, 256 }
 0x44c   : > { %p1891_p5 = scmp.ne.s32.totalorder %s2285_s6, %s1890_s15  ;;  %p1895_p4 = scmp.lt.s32.totalorder %s2285_s6, %s2325_s2 }
 0x44d   : > { %p1896_p6 = scmp.lt.s32.totalorder %s1894_s25, %s1890_s15 }
 0x44e   : > { %p1892_p2 = pnand %p1891_p5, %p2343_p11 }
 0x44f   : > { %p1897_p8 = por %p1896_p6, %p1895_p4 }
 0x450   : > { %p1893_p1 = pneg %p1892_p2 }
 0x452   : > { %p1898_p3 = pnand %p1897_p8, %p1893_p1 }
 0x454   : > { %1901 = shalt.err (!%p1898_p3)
}
 0x455   : > { %1721 = dma.vmem_to_hbm [thread:$0]  (%p2343_p11), %s1448_s4, 128, %s2285_s6, %s1434_s7  }
 0x456 PF: > { %s1459_s18 = sand.u32 1, %s1932_s9   ;;  %p2344_p7 = scmp.ne.s32.totalorder %s2331_s16, 0 }
 0x457   : > { %p2345_p9 = scmp.ge.s32.totalorder %s1944_s12, 2  ;;  %s1460_s19 = scalar_lea.sflag [#allocation4], %s1459_s18 }
 0x459   : > { %p1732_p10 = pnand %p2345_p9, %p2344_p7 }
 0x45b   : > { %p1733_p12 = pneg %p1732_p10 }
 0x45d   : > { %1927 = dma.done.wait (%p1733_p12), %s1460_s19, 128  }
 0x45e   : > { %1929 = vsyncadd (%p1733_p12), %s1460_s19, 4294967168  ;;  %p16_p13 = scmp.ge.s32.totalorder %s2029_s21, 4   ;;  %s2346_s9 = smov %s1936_s10 }
 0x45f   : > { %s2347_s10 = smov %s1940_s11  ;;  %s2348_s11 = smov %s2049_s29 }
 0x460   : > { %s2349_s12 = smov %s2029_s21  ;;  %18 = sbr.rel (!%p16_p13) target bundleno = 6 (0x6), region = 77 }
 0x465   :  { %1465 = vsyncpa [#allocation3], 1 }
 0x466   :  { %1467 = vsyncpa [#allocation3 + $0x1], 1 }
 0x467   :  { %1468 = vsyncpa [#allocation6], 1 }
 0x468   :  { %1469 = vsyncpa [#allocation4], 1 }
 0x469   :  { %1471 = vsyncpa [#allocation4 + $0x1], 1 }

</bundles_post_ra>
